<compile_context>
chip_gen: v6e
topology: v6e:2x2x1
jax: 0.10.0
libtpu: 0.0.40
codegen_flags: <defaults>
</compile_context>

<pallas_src>
import jax
import jax.numpy as jnp
from jax.experimental import pallas as pl
from jax.experimental.pallas import tpu as pltpu

_EPS = 1e-6

# Lane-axis batch tile (transposed layout, D on sublanes): multiple of 128.
_TB_LANE = 1024
# Sublane-axis batch tile (row-major layout, D on lanes): multiple of 8,
# kept small so the five (TB, 1) keepdims intermediates don't spill vregs.
_TB_ROW = 256


def _loss_kernel_cols(a_ref, p_ref, n_ref, out_ref):
    """Transposed layout: blocks are (D, TB); reduce over axis=0 (sublanes).

    Output is a lane-dense (1, TB) row of per-sample losses.
    """
    a = a_ref[...].astype(jnp.float32)
    p = p_ref[...].astype(jnp.float32)
    n = n_ref[...].astype(jnp.float32)

    dot_ap = jnp.sum(a * p, axis=0, keepdims=True)   # (1, TB)
    dot_an = jnp.sum(a * n, axis=0, keepdims=True)   # (1, TB)
    sq_a = jnp.sum(a * a, axis=0, keepdims=True)     # (1, TB)
    sq_p = jnp.sum(p * p, axis=0, keepdims=True)     # (1, TB)
    sq_n = jnp.sum(n * n, axis=0, keepdims=True)     # (1, TB)

    # torch.nn.CosineSimilarity(dim=1, eps=1e-6): cos = x.y / max(||x||*||y||, eps)
    denom_ap = jnp.maximum(jnp.sqrt(sq_a * sq_p), _EPS)
    denom_an = jnp.maximum(jnp.sqrt(sq_a * sq_n), _EPS)
    cos_ap = dot_ap / denom_ap
    cos_an = dot_an / denom_an

    out_ref[...] = (1.0 - cos_ap) + jnp.maximum(cos_an - 0.5, 0.0)


def _loss_kernel_rows(a_ref, p_ref, n_ref, out_ref):
    """Row-major layout: blocks are (TB, D); reduce over axis=1 (lanes)."""
    a = a_ref[...].astype(jnp.float32)
    p = p_ref[...].astype(jnp.float32)
    n = n_ref[...].astype(jnp.float32)

    dot_ap = jnp.sum(a * p, axis=1, keepdims=True)   # (TB, 1)
    dot_an = jnp.sum(a * n, axis=1, keepdims=True)   # (TB, 1)
    sq_a = jnp.sum(a * a, axis=1, keepdims=True)     # (TB, 1)
    sq_p = jnp.sum(p * p, axis=1, keepdims=True)     # (TB, 1)
    sq_n = jnp.sum(n * n, axis=1, keepdims=True)     # (TB, 1)

    denom_ap = jnp.maximum(jnp.sqrt(sq_a * sq_p), _EPS)
    denom_an = jnp.maximum(jnp.sqrt(sq_a * sq_n), _EPS)
    cos_ap = dot_ap / denom_ap
    cos_an = dot_an / denom_an

    out_ref[...] = (1.0 - cos_ap) + jnp.maximum(cos_an - 0.5, 0.0)


def _cost_estimate(B, D, itemsize):
    return pl.CostEstimate(
        flops=int(10 * B * D),            # 5 elementwise products + 5 reductions
        transcendentals=int(5 * B),       # 2 sqrt + 2 div (+ slack) per row
        bytes_accessed=int(3 * B * D * itemsize + 4 * B),
    )


def online_reciprocal_softmax_loss(anchor_embed, pos_embed, neg_embed,
                                   preds=None, labels=None, labels_neg=None,
                                   margin=0.0, lambda_factor=0.01):
    """Pallas implementation of OnlineReciprocalSoftmaxLoss.forward.

    preds / labels / labels_neg / margin / lambda_factor are accepted for
    signature parity with the PyTorch module but do not affect the returned
    loss (loss_softmax is the constant 1 in the reference forward).
    """
    # TODO(synk): triplet_selector.get_triplets is an external, data-dependent
    # CPU routine whose result is discarded (num_triplets forced to 0) in the
    # reference forward, so it is intentionally not implemented.
    B, D = anchor_embed.shape
    itemsize = jnp.dtype(anchor_embed.dtype).itemsize
    cost = _cost_estimate(B, D, itemsize)
    params = pltpu.CompilerParams(dimension_semantics=("parallel",))

    if D < 128:
        # Small embedding dim: put the batch on the 128-wide lane axis.
        # Layout plumbing (transpose/pad) stays in the wrapper.
        at = anchor_embed.T          # (D, B)
        pt = pos_embed.T
        nt = neg_embed.T
        if B <= _TB_LANE:
            tb, b_pad = B, B
        else:
            tb = _TB_LANE
            b_pad = pl.cdiv(B, tb) * tb
            pad = b_pad - B
            at = jnp.pad(at, ((0, 0), (0, pad)))
            pt = jnp.pad(pt, ((0, 0), (0, pad)))
            nt = jnp.pad(nt, ((0, 0), (0, pad)))

        in_spec = pl.BlockSpec((D, tb), lambda i: (0, i))
        losses = pl.pallas_call(
            _loss_kernel_cols,
            out_shape=jax.ShapeDtypeStruct((1, b_pad), jnp.float32),
            grid=(b_pad // tb,),
            in_specs=[in_spec, in_spec, in_spec],
            out_specs=pl.BlockSpec((1, tb), lambda i: (0, i)),
            compiler_params=params,
            cost_estimate=cost,
        )(at, pt, nt)
        per_row = losses[0, :B]
    else:
        # Large embedding dim: D rides the lane axis, tile over batch rows.
        a, p, n = anchor_embed, pos_embed, neg_embed
        if B <= _TB_ROW:
            tb, b_pad = B, B
        else:
            tb = _TB_ROW
            b_pad = pl.cdiv(B, tb) * tb
            pad = b_pad - B
            a = jnp.pad(a, ((0, pad), (0, 0)))
            p = jnp.pad(p, ((0, pad), (0, 0)))
            n = jnp.pad(n, ((0, pad), (0, 0)))

        in_spec = pl.BlockSpec((tb, D), lambda i: (i, 0))
        losses = pl.pallas_call(
            _loss_kernel_rows,
            out_shape=jax.ShapeDtypeStruct((b_pad, 1), jnp.float32),
            grid=(b_pad // tb,),
            in_specs=[in_spec, in_spec, in_spec],
            out_specs=pl.BlockSpec((tb, 1), lambda i: (i, 0)),
            compiler_params=params,
            cost_estimate=cost,
        )(a, p, n)
        per_row = losses[:B, 0]

    # Mean over the (un-padded) batch is O(B); keep it in XLA so the grid
    # axis stays independent ("parallel") and per-tile results stay correct.
    loss_total = jnp.mean(per_row)
    loss_softmax = 1
    # Matches PyTorch return: (loss_total, triplet_losses.mean(), loss_softmax)
    return loss_total, loss_total, loss_softmax, per_row


def _reference(anchor, pos, neg):
    """Plain-JAX reference for sanity checking."""
    def cos(x1, x2):
        num = jnp.sum(x1 * x2, axis=1)
        den = jnp.maximum(jnp.linalg.norm(x1, axis=1) *
                          jnp.linalg.norm(x2, axis=1), _EPS)
        return num / den
    ap = 1.0 - cos(anchor, pos)
    t2 = jnp.maximum(cos(anchor, neg) - 0.5, 0.0)
    losses = ap + t2
    return jnp.mean(losses), losses


if __name__ == "__main__":
    key = jax.random.PRNGKey(0)

    # --- Case 1: small embedding dim (D < 128) -> transposed/lane-dense path.
    B, D = 8, 32
    k1, k2, k3, k4 = jax.random.split(key, 4)
    anchor = jax.random.normal(k1, (B, D), dtype=jnp.float32)
    pos = jax.random.normal(k2, (B, D), dtype=jnp.float32)
    neg = jax.random.normal(k3, (B, D), dtype=jnp.float32)

    # Unused-by-the-loss inputs, kept for forward() signature parity.
    num_classes = 4
    preds = jax.random.normal(k4, (3 * B, num_classes), dtype=jnp.float32)
    labels = jnp.zeros((B,), dtype=jnp.int32)
    labels_neg = jnp.ones((B,), dtype=jnp.int32)

    loss_total, loss_mean, loss_softmax, per_row = online_reciprocal_softmax_loss(
        anchor, pos, neg, preds, labels, labels_neg)
    jax.block_until_ready((loss_total, loss_mean, per_row))

    ref_mean, ref_losses = _reference(anchor, pos, neg)
    assert jnp.allclose(loss_total, ref_mean, atol=1e-5, rtol=1e-5)
    assert jnp.allclose(per_row, ref_losses, atol=1e-5, rtol=1e-5)
    assert loss_softmax == 1

    # --- Case 2: larger embedding dim (D >= 128) -> row-major path.
    B2, D2 = 16, 256
    q1, q2, q3 = jax.random.split(jax.random.PRNGKey(1), 3)
    a2 = jax.random.normal(q1, (B2, D2), dtype=jnp.float32)
    p2 = jax.random.normal(q2, (B2, D2), dtype=jnp.float32)
    n2 = jax.random.normal(q3, (B2, D2), dtype=jnp.float32)
    lt2, lm2, ls2, pr2 = online_reciprocal_softmax_loss(a2, p2, n2)
    jax.block_until_ready((lt2, pr2))
    ref_mean2, ref_losses2 = _reference(a2, p2, n2)
    assert jnp.allclose(lt2, ref_mean2, atol=1e-5, rtol=1e-5)
    assert jnp.allclose(pr2, ref_losses2, atol=1e-5, rtol=1e-5)

    print("KERNEL_OK")
</pallas_src>

<mosaic_0001>
module attributes {stable_mosaic.version = 11 : i64} {
  func.func @_loss_kernel_cols(%arg0: i32, %arg1: memref<32x8xf32, #tpu.memory_space<vmem>>, %arg2: memref<32x8xf32, #tpu.memory_space<vmem>>, %arg3: memref<32x8xf32, #tpu.memory_space<vmem>>, %arg4: memref<1x8xf32, #tpu.memory_space<vmem>>) attributes {dimension_semantics = [#tpu.dimension_semantics<parallel>], iteration_bounds = array<i64: 1>, scalar_prefetch = 0 : i64, scratch_operands = 0 : i64, tpu.core_type = #tpu.core_type<tc>, window_params = [{transform_indices = @transform_0, window_bounds = array<i64: 32, 8>}, {transform_indices = @transform_1, window_bounds = array<i64: 32, 8>}, {transform_indices = @transform_2, window_bounds = array<i64: 32, 8>}, {transform_indices = @transform_3, window_bounds = array<i64: 1, 8>}]} {
    %c0 = arith.constant 0 : index
    %c0_0 = arith.constant 0 : index
    %0 = vector.load %arg1[%c0, %c0_0] : memref<32x8xf32, #tpu.memory_space<vmem>>, vector<32x8xf32>
    %c0_1 = arith.constant 0 : index
    %c0_2 = arith.constant 0 : index
    %1 = vector.load %arg2[%c0_1, %c0_2] : memref<32x8xf32, #tpu.memory_space<vmem>>, vector<32x8xf32>
    %c0_3 = arith.constant 0 : index
    %c0_4 = arith.constant 0 : index
    %2 = vector.load %arg3[%c0_3, %c0_4] : memref<32x8xf32, #tpu.memory_space<vmem>>, vector<32x8xf32>
    %3 = arith.mulf %0, %1 : vector<32x8xf32>
    %cst = arith.constant dense<0.000000e+00> : vector<8xf32>
    %4 = vector.multi_reduction <add>, %3, %cst [0] : vector<32x8xf32> to vector<8xf32>
    %5 = vector.shape_cast %4 : vector<8xf32> to vector<1x8xf32>
    %6 = arith.mulf %0, %2 : vector<32x8xf32>
    %cst_5 = arith.constant dense<0.000000e+00> : vector<8xf32>
    %7 = vector.multi_reduction <add>, %6, %cst_5 [0] : vector<32x8xf32> to vector<8xf32>
    %8 = vector.shape_cast %7 : vector<8xf32> to vector<1x8xf32>
    %9 = arith.mulf %0, %0 : vector<32x8xf32>
    %cst_6 = arith.constant dense<0.000000e+00> : vector<8xf32>
    %10 = vector.multi_reduction <add>, %9, %cst_6 [0] : vector<32x8xf32> to vector<8xf32>
    %11 = vector.shape_cast %10 : vector<8xf32> to vector<1x8xf32>
    %12 = arith.mulf %1, %1 : vector<32x8xf32>
    %cst_7 = arith.constant dense<0.000000e+00> : vector<8xf32>
    %13 = vector.multi_reduction <add>, %12, %cst_7 [0] : vector<32x8xf32> to vector<8xf32>
    %14 = vector.shape_cast %13 : vector<8xf32> to vector<1x8xf32>
    %15 = arith.mulf %2, %2 : vector<32x8xf32>
    %cst_8 = arith.constant dense<0.000000e+00> : vector<8xf32>
    %16 = vector.multi_reduction <add>, %15, %cst_8 [0] : vector<32x8xf32> to vector<8xf32>
    %17 = vector.shape_cast %16 : vector<8xf32> to vector<1x8xf32>
    %18 = arith.mulf %11, %14 : vector<1x8xf32>
    %19 = math.sqrt %18 : vector<1x8xf32>
    %cst_9 = arith.constant 9.99999997E-7 : f32
    %20 = vector.broadcast %cst_9 : f32 to vector<1x8xf32>
    %21 = arith.maximumf %19, %20 : vector<1x8xf32>
    %22 = arith.mulf %11, %17 : vector<1x8xf32>
    %23 = math.sqrt %22 : vector<1x8xf32>
    %cst_10 = arith.constant 9.99999997E-7 : f32
    %24 = vector.broadcast %cst_10 : f32 to vector<1x8xf32>
    %25 = arith.maximumf %23, %24 : vector<1x8xf32>
    %26 = arith.divf %5, %21 : vector<1x8xf32>
    %27 = arith.divf %8, %25 : vector<1x8xf32>
    %cst_11 = arith.constant 1.000000e+00 : f32
    %28 = vector.broadcast %cst_11 : f32 to vector<1x8xf32>
    %29 = arith.subf %28, %26 : vector<1x8xf32>
    %cst_12 = arith.constant 5.000000e-01 : f32
    %30 = vector.broadcast %cst_12 : f32 to vector<1x8xf32>
    %31 = arith.subf %27, %30 : vector<1x8xf32>
    %cst_13 = arith.constant 0.000000e+00 : f32
    %32 = vector.broadcast %cst_13 : f32 to vector<1x8xf32>
    %33 = arith.maximumf %31, %32 : vector<1x8xf32>
    %34 = arith.addf %29, %33 : vector<1x8xf32>
    %c0_14 = arith.constant 0 : index
    %c0_15 = arith.constant 0 : index
    %35 = vector.load %arg4[%c0_14, %c0_15] : memref<1x8xf32, #tpu.memory_space<vmem>>, vector<1x8xf32>
    tpu.vector_store %arg4[%c0_14, %c0_15], %34 {strides = array<i32>} : memref<1x8xf32, #tpu.memory_space<vmem>>, vector<1x8xf32>,
    return
  }
  func.func @transform_0(%arg0: i32) -> (i32, i32) {
    %c0_i32 = arith.constant 0 : i32
    %c0_i32_0 = arith.constant 0 : i32
    return %c0_i32, %arg0 : i32, i32
  }
  func.func @transform_1(%arg0: i32) -> (i32, i32) {
    %c0_i32 = arith.constant 0 : i32
    %c0_i32_0 = arith.constant 0 : i32
    return %c0_i32, %arg0 : i32, i32
  }
  func.func @transform_2(%arg0: i32) -> (i32, i32) {
    %c0_i32 = arith.constant 0 : i32
    %c0_i32_0 = arith.constant 0 : i32
    return %c0_i32, %arg0 : i32, i32
  }
  func.func @transform_3(%arg0: i32) -> (i32, i32) {
    %c0_i32 = arith.constant 0 : i32
    %c0_i32_0 = arith.constant 0 : i32
    return %c0_i32, %arg0 : i32, i32
  }
}

</mosaic_0001>

<bundles_post_ra>
// kernel: tpu_custom_call.1
= control target key start
LH: loop header
LB: loop body
LE: loop exit
PB: predicated region body
PF: predicated region fallthrough
CT: control target
= control target key end

     0   :  { %8 = vsyncpa [#allocation3], 0  ;;  %vm31_vm0 = vcmask 64512   ;;  %vm139_vm5 = vcmask 57344   ;;  %s284_s0 = inlined_call_operand.vmem [shape: f32[32,8], index: 0, kind: input, shape index: {}]   ;;  %s285_s1 = inlined_call_operand.vmem [shape: f32[32,8], index: 1, kind: input, shape index: {}]   ;;  %s286_s2 = inlined_call_operand.vmem [shape: f32[32,8], index: 2, kind: input, shape index: {}]   ;;  %s287_s3 = inlined_call_operand.hbm [shape: f32[1,8], index: 3, kind: output, shape index: {}]  }
   0x1   :  { %v15_v0 = vld [vmem:[%s284_s0] sm:$0xff]  ;;  %v16_v1 = vld [vmem:[%s284_s0 + $0x8] sm:$0xff]  ;;  %v217_v2 = vld [vmem:[%s284_s0 + $0x10] sm:$0xff] }
   0x2   :  { %v62_v3 = vmul.f32 %v15_v0, %v15_v0  ;;  %v222_v4 = vld [vmem:[%s284_s0 + $0x18] sm:$0xff]  ;;  %v19_v5 = vld [vmem:[%s285_s1] sm:$0xff]  ;;  %v63_v6 = vmul.f32 %v16_v1, %v16_v1  ;;  %v64_v7 = vmul.f32 %v217_v2, %v217_v2  ;;  %v20_v8 = vld [vmem:[%s285_s1 + $0x8] sm:$0xff] }
   0x3   :  { %v65_v9 = vmul.f32 %v222_v4, %v222_v4  ;;  %v79_v11 = vmul.f32 %v19_v5, %v19_v5  ;;  %v21_v12 = vld [vmem:[%s285_s1 + $0x10] sm:$0xff]  ;;  %v241_v13 = vld [vmem:[%s285_s1 + $0x18] sm:$0xff]  ;;  %v23_v14 = vld [vmem:[%s286_s2] sm:$0xff]  ;;  %v80_v18 = vmul.f32 %v20_v8, %v20_v8  ;;  %v27_v56 = vmul.f32 %v19_v5, %v15_v0 }
   0x4   :  { %v66_v10 = vsel %vm31_vm0, %v62_v3, 0.0  ;;  %v67_v15 = vsel %vm31_vm0, %v63_v6, 0.0  ;;  %v69_v16 = vsel %vm31_vm0, %v64_v7, 0.0  ;;  %v24_v19 = vld [vmem:[%s286_s2 + $0x8] sm:$0xff]  ;;  %v25_v20 = vld [vmem:[%s286_s2 + $0x10] sm:$0xff]  ;;  %v81_v22 = vmul.f32 %v21_v12, %v21_v12  ;;  %v26_v25 = vld [vmem:[%s286_s2 + $0x18] sm:$0xff] }
   0x5   :  { %v68_v17 = vadd.f32 %v67_v15, %v66_v10  ;;  %v71_v21 = vsel %vm31_vm0, %v65_v9, 0.0  ;;  %v82_v23 = vmul.f32 %v241_v13, %v241_v13  ;;  %v83_v24 = vsel %vm31_vm0, %v79_v11, 0.0  ;;  %s187_s2 = smov [#allocation2]  }
   0x6   :  { %v84_v27 = vsel %vm31_vm0, %v80_v18, 0.0  ;;  %v96_v28 = vmul.f32 %v23_v14, %v23_v14  ;;  %v86_v30 = vsel %vm31_vm0, %v81_v22, 0.0  ;;  %v97_v33 = vmul.f32 %v24_v19, %v24_v19  ;;  %s147_s7 = sshll.u32 %s187_s2, 4  ;;  %s148_s7 = int_to_ptr.vmem [resolvable:$true] %s147_s7 }
   0x7   :  { %v70_v26 = vadd.f32 %v69_v16, %v68_v17  ;;  %v85_v29 = vadd.f32 %v84_v27, %v83_v24  ;;  %v88_v32 = vsel %vm31_vm0, %v82_v23, 0.0  ;;  %v98_v34 = vmul.f32 %v25_v20, %v25_v20  ;;  %s165_s8 = scalar_lea.vmem %s148_s7, 16  ;;  %s169_s9 = scalar_lea.vmem %s148_s7, 32 }
   0x8   :  { %v99_v36 = vmul.f32 %v26_v25, %v26_v25  ;;  %v100_v37 = vsel %vm31_vm0, %v96_v28, 0.0  ;;  %v101_v39 = vsel %vm31_vm0, %v97_v33, 0.0  ;;  %v28_v57 = vmul.f32 %v20_v8, %v16_v1  ;;  %p166_p0 = scmp.ne.s32.totalorder %s148_s7, %s165_s8  ;;  %p170_p1 = scmp.lt.s32.totalorder %s148_s7, %s148_s7 }
   0x9   :  { %v72_v31 = vadd.f32 %v71_v21, %v70_v26  ;;  %v87_v35 = vadd.f32 %v86_v30, %v85_v29  ;;  %v103_v40 = vsel %vm31_vm0, %v98_v34, 0.0  ;;  %v102_v42 = vadd.f32 %v101_v39, %v100_v37  ;;  %p171_p2 = scmp.lt.s32.totalorder %s169_s9, %s165_s8 }
   0xa   :  { %v105_v44 = vsel %vm31_vm0, %v99_v36, 0.0  ;;  %v45_v60 = vmul.f32 %v23_v14, %v15_v0  ;;  %v46_v61 = vmul.f32 %v24_v19, %v16_v1  ;;  %v29_v6 = vmul.f32 %v21_v12, %v217_v2 }
   0xb   :  { %v73_v38 = vrot.slane %v72_v31, 4  ;;  %v89_v41 = vadd.f32 %v88_v32, %v87_v35  ;;  %v104_v46 = vadd.f32 %v103_v40, %v102_v42  ;;  %v32_v7 = vsel %vm31_vm0, %v27_v56, 0.0  ;;  %p172_p3 = por %p171_p2, %p170_p1 }
   0xc   :  { %v33_v9 = vsel %vm31_vm0, %v28_v57, 0.0  ;;  %v47_v15 = vmul.f32 %v25_v20, %v217_v2  ;;  %v49_v5 = vsel %vm31_vm0, %v45_v60, 0.0  ;;  %v50_v8 = vsel %vm31_vm0, %v46_v61, 0.0 }
   0xd   :  { %v74_v43 = vadd.f32 %v73_v38, %v72_v31  ;;  %v90_v45 = vrot.slane %v89_v41, 4  ;;  %v106_v49 = vadd.f32 %v105_v44, %v104_v46  ;;  %v34_v16 = vadd.f32 %v33_v9, %v32_v7  ;;  %p173_p4 = pnand %p172_p3, %p166_p0 }
   0xe   :  { %v30_v1 = vmul.f32 %v241_v13, %v222_v4  ;;  %v35_v12 = vsel %vm31_vm0, %v29_v6, 0.0  ;;  %v51_v14 = vadd.f32 %v50_v8, %v49_v5  ;;  %v48_v18 = vmul.f32 %v26_v25, %v222_v4 }
   0xf   :  { %v75_v47 = vrot.slane %v74_v43, 2  ;;  %v91_v48 = vadd.f32 %v90_v45, %v89_v41  ;;  %v107_v52 = vrot.slane %v106_v49, 4  ;;  %v52_v19 = vsel %vm31_vm0, %v47_v15, 0.0 }
  0x10   :  { %v36_v21 = vadd.f32 %v35_v12, %v34_v16  ;;  %v37_v2 = vsel %vm31_vm0, %v30_v1, 0.0  ;;  %v53_v20 = vadd.f32 %v52_v19, %v51_v14  ;;  %v54_v22 = vsel %vm31_vm0, %v48_v18, 0.0 }
  0x11   :  { %v76_v50 = vadd.f32 %v75_v47, %v74_v43  ;;  %v92_v51 = vrot.slane %v91_v48, 2  ;;  %v108_v55 = vadd.f32 %v107_v52, %v106_v49 }
  0x12   :  { %v38_v23 = vadd.f32 %v37_v2, %v36_v21  ;;  %v55_v24 = vadd.f32 %v54_v22, %v53_v20 }
  0x13   :  { %v77_v53 = vrot.slane %v76_v50, 1  ;;  %v93_v54 = vadd.f32 %v92_v51, %v91_v48  ;;  %v109_v59 = vrot.slane %v108_v55, 2 }
  0x14   :  { %v39_v26 = vrot.slane %v38_v23, 4  ;;  %v56_v28 = vrot.slane %v55_v24, 4 }
  0x15   :  { %v94_v58 = vrot.slane %v93_v54, 1  ;;  %v78_v62 = vadd.f32 %v77_v53, %v76_v50  ;;  %v110_v3 = vadd.f32 %v109_v59, %v108_v55 }
  0x16   :  { %v40_v30 = vadd.f32 %v39_v26, %v38_v23  ;;  %v57_v33 = vadd.f32 %v56_v28, %v55_v24 }
  0x17   :  { %v95_v63 = vadd.f32 %v94_v58, %v93_v54  ;;  %v111_v10 = vrot.slane %v110_v3, 1 }
  0x18   :  { %v41_v36 = vrot.slane %v40_v30, 2  ;;  %v58_v39 = vrot.slane %v57_v33, 2 }
  0x19   :  { %v113_v11 = vmul.f32 %v95_v63, %v78_v62  ;;  %v112_v0 = vadd.f32 %v111_v10, %v110_v3 }
  0x1a   :  { %v42_v41 = vadd.f32 %v41_v36, %v40_v30  ;;  %v59_v42 = vadd.f32 %v58_v39, %v57_v33 }
  0x1b   :  { %157 = vrsqrt.f32 %v113_v11  ;;  %v122_v17 = vmul.f32 %v112_v0, %v78_v62  ;;  %vm116_vm1 = vcmp.eq.f32.partialorder %v113_v11, inf  ;;  %v119_v13 = vand.u32 2147483648, %v113_v11 }
  0x1c   :  { %vm118_vm2 = vcmp.eq.f32.partialorder %v113_v11, 0.0  ;;  %v43_v43 = vrot.slane %v42_v41, 1  ;;  %v60_v44 = vrot.slane %v59_v42, 1 }
  0x1d   :  { %159 = vrsqrt.f32 %v122_v17  ;;  %vm125_vm3 = vcmp.eq.f32.partialorder %v122_v17, inf  ;;  %v128_v32 = vand.u32 2147483648, %v122_v17  ;;  %vm127_vm4 = vcmp.eq.f32.partialorder %v122_v17, 0.0 }
  0x1e   :  { %v44_v45 = vadd.f32 %v43_v43, %v42_v41  ;;  %v61_v47 = vadd.f32 %v60_v44, %v59_v42 }
  0x28   :  { %v158_v27 = vpop.eup %157 }
  0x29   :  { %v115_v29 = vmul.f32 %v158_v27, %v113_v11 }
  0x2a   :  { %v160_v25 = vpop.eup %159 }
  0x2b   :  { %v117_v4 = vsel %vm116_vm1, %v113_v11, %v115_v29  ;;  %v124_v35 = vmul.f32 %v160_v25, %v122_v17 }
  0x2c   :  { %v120_v31 = vsel %vm118_vm2, %v119_v13, %v117_v4 }
  0x2d   :  { %v121_v34 = vmax.f32 %v120_v31, 1e-06  ;;  %v126_v37 = vsel %vm125_vm3, %v122_v17, %v124_v35 }
  0x2e   :  { %v129_v38 = vsel %vm127_vm4, %v128_v32, %v126_v37 }
  0x2f   :  { %161 = vrcp.f32 %v121_v34  ;;  %v130_v40 = vmax.f32 %v129_v38, 1e-06 }
  0x31   :  { %163 = vrcp.f32 %v130_v40 }
  0x3c   :  { %v162_v46 = vpop.eup %161 }
  0x3d   :  { %v132_v48 = vmul.f32 %v162_v46, %v44_v45 }
  0x3e   :  { %v164_v49 = vpop.eup %163 }
  0x3f   :  { %v134_v50 = vmul.f32 %v164_v49, %v61_v47  ;;  %v135_v51 = vsub.f32 1.0, %v132_v48 }
  0x41   :  { %v155_v52 = vadd.f32 -0.5, %v134_v50 }
  0x43   :  { %v137_v53 = vmax.f32 %v155_v52, 0.0 }
  0x45   :  { %v138_v54 = vadd.f32 %v137_v53, %v135_v51 }
  0x47   :  { %140 = vst.msk [vmem:[#allocation2] sm:$0x1] %vm139_vm5, %v138_v54 }
  0x48   :  { %176 = shalt.err (!%p173_p4)
}
  0x49   :  { %150 = dma.vmem_to_hbm [thread:$0]  %s148_s7, 16, %s287_s3, [#allocation3]  }
  0x4a   :  { %185 = dma.done.wait [#allocation3], 16  }
  0x4b   :  { %186 = vsyncadd [#allocation3], 4294967280 }
  0x4c   :  { %154 = vsyncpa [#allocation3], 1 }

</bundles_post_ra>
